<compile_context>
chip_gen: v7x
topology: tpu7x:2x2x1
jax: 0.10.0
libtpu: 0.0.40
codegen_flags: <defaults>
</compile_context>

<pallas_src>
import jax
import jax.numpy as jnp
from jax import lax
from jax.experimental import pallas as pl
from jax.experimental.pallas import tpu as pltpu

KRNL_W = 5   # krnl_size = (1, 5)
PAD = 2      # ReflectionPad2d((2, 2, 0, 0))
EPS = 1e-5


# ------------------------- trace-time weight folding ---------------------------------

def _reflect(j, W):
    if j < 0:
        return -j
    if j >= W:
        return 2 * W - 2 - j
    return j


def _conv_matrix(w_taps, W, C):
    """Fold ReflectionPad2d((2,2,0,0)) + Conv2d(C, C, (1,5)) into one dense
    (W*C, W*C) matrix acting on the lane-flattened (w, c) axis.
    w_taps: (5*C, C), rows [k*C:(k+1)*C] = tap k as a (Cin, Cout) matrix."""
    M = jnp.zeros((W * C, W * C), jnp.float32)
    for wo in range(W):
        for k in range(KRNL_W):
            si = _reflect(wo + k - PAD, W)
            M = M.at[si * C:(si + 1) * C, wo * C:(wo + 1) * C].add(
                w_taps[k * C:(k + 1) * C, :])
    return M


def _lane_bias(b, W):
    """(1,1,C) conv bias -> (1, W*C) lane vector (lane index = w*C + c)."""
    return jnp.tile(b.reshape(-1), W).reshape(1, -1)


def _finish_bn(partial_stats, count, gamma, beta, W, C):
    """Reduce per-tile (sum, sum_sq) partials to folded per-lane BN scale/shift.
    Partials are kept in f32 (E[x^2]-E[x]^2 cancellation concern); activations here
    have |mean| ~ std so single-sweep stats are numerically fine."""
    s = jnp.sum(partial_stats, axis=0)            # (2, W*C)
    s = s.reshape(2, W, C).sum(axis=1)            # (2, C)  (per-channel over N,H,W)
    mean = s[0] / count
    var = s[1] / count - mean * mean              # biased variance (PyTorch BN forward)
    inv = lax.rsqrt(var + EPS)
    scale_c = gamma.reshape(-1) * inv
    shift_c = beta.reshape(-1) - mean * scale_c
    scale = jnp.tile(scale_c, W).reshape(1, W * C)
    shift = jnp.tile(shift_c, W).reshape(1, W * C)
    return scale, shift


# ------------------------- Pallas kernels ---------------------------------------------

def _write_partial_stats(st_ref, t):
    # Two direct row stores (no concatenate -> no sublane relayout before the store).
    # Stats stay f32 and are computed from the pre-bf16-cast value `t`.
    st_ref[0, 0:1, :] = jnp.sum(t, axis=0, keepdims=True)
    st_ref[0, 1:2, :] = jnp.sum(t * t, axis=0, keepdims=True)


def _stage_a_kernel(x_ref, ma_ref, ba_ref, z_ref, st_ref):
    """conv_1x1 -> (pad+conv_1) -> (pad+conv_2) folded into ONE matmul (MA, bA);
    emit z (bf16) and per-tile BN1 partial stats (f32, from the pre-cast value)."""
    xb = x_ref[...].astype(jnp.bfloat16)
    z = jnp.dot(xb, ma_ref[...], preferred_element_type=jnp.float32) + ba_ref[...]
    _write_partial_stats(st_ref, z)
    z_ref[...] = z.astype(z_ref.dtype)


def _stage_b_kernel(z_ref, s1_ref, t1_ref, mb_ref, cb_ref, w_ref, st_ref):
    """bn_1 (folded per-lane FMA, f32) -> ReLU -> (pad+conv_3) -> (pad+conv_4) folded
    into ONE matmul (MB, cB); emit w (bf16) + per-tile BN2 partial stats (f32)."""
    y = jnp.maximum(z_ref[...].astype(jnp.float32) * s1_ref[...] + t1_ref[...], 0.0)
    w = jnp.dot(y.astype(jnp.bfloat16), mb_ref[...],
                preferred_element_type=jnp.float32) + cb_ref[...]
    _write_partial_stats(st_ref, w)
    w_ref[...] = w.astype(w_ref.dtype)


def _stage_c_kernel(x_ref, a1_ref, b1_ref, w_ref, s2_ref, t2_ref, z_dead_ref, o_ref):
    """bn_2 (folded FMA, f32) + residual add; identity = conv_1x1(x) recomputed per
    tile (cheaper than an extra HBM round trip).  z_dead_ref is only the donated HBM
    buffer (stage-A z, dead after stage B) aliased to the output — never read."""
    del z_dead_ref
    identity = jnp.dot(x_ref[...].astype(jnp.bfloat16), a1_ref[...],
                       preferred_element_type=jnp.float32) + b1_ref[...]
    o_ref[...] = (w_ref[...].astype(jnp.float32) * s2_ref[...] + t2_ref[...]
                  + identity).astype(o_ref.dtype)


# ------------------------- wrapper -----------------------------------------------------

def _choose_block_p(P, WC):
    """Largest P tile that divides P, keeps ~<=16 MiB of double-buffered activation
    tiles in VMEM, and keeps T = P//bp >= 2 (preferably even) so the "parallel" grid
    axis can shard across both v7x TensorCores."""
    budget_rows = max(8, (16 * 1024 * 1024) // (WC * 16))
    cands = [bp for bp in (2048, 1024, 512, 256, 128, 64, 32, 16, 8)
             if bp <= budget_rows and P % bp == 0]
    for bp in cands:
        if P // bp >= 2 and (P // bp) % 2 == 0:
            return bp
    for bp in cands:
        if P // bp >= 2:
            return bp
    return P


def _vmem_limit_bytes():
    """Per-generation scoped-VMEM budget: ~5/8 of physical, capped at 64 MiB
    (-> ~64 MiB on v5e/v6e, ~40 MiB on v7x).  Falls back to 32 MiB if unknown."""
    try:
        cap = int(pltpu.get_tpu_info().vmem_capacity_bytes)
    except Exception:
        cap = 0
    if cap <= 0:
        return 32 * 1024 * 1024
    return int(min(64 * 1024 * 1024, (cap * 5) // 8))


def subblock_type_a(x_nchw, params, block_p=None):
    N, Cin, H, W = x_nchw.shape
    C = params['w1x1'].shape[1]                    # out_chs
    assert W >= PAD + 1, "ReflectionPad2d((2,2,0,0)) requires W >= 3"
    P = N * H
    WCin, WC = W * Cin, W * C

    bp = _choose_block_p(P, WC) if block_p is None else block_p
    assert P % bp == 0 and (bp % 8 == 0 or bp == P), (P, bp)
    T = P // bp

    # lane-dense layout: (P, W*C), lane index = w*C + c
    x2 = jnp.transpose(x_nchw, (0, 2, 3, 1)).reshape(P, WCin)

    # Fold pad+conv / 1x1 conv into dense matrices + lane-bias vectors (trace time).
    A1 = jnp.kron(jnp.eye(W, dtype=jnp.float32), params['w1x1'])   # (W*Cin, W*C)
    b1 = _lane_bias(params['b1x1'], W)
    M1 = _conv_matrix(params['wc1'], W, C); c1 = _lane_bias(params['bc1'], W)
    M2 = _conv_matrix(params['wc2'], W, C); c2 = _lane_bias(params['bc2'], W)
    M3 = _conv_matrix(params['wc3'], W, C); c3 = _lane_bias(params['bc3'], W)
    M4 = _conv_matrix(params['wc4'], W, C); c4 = _lane_bias(params['bc4'], W)

    # Pre-multiply the linear chains (trace time, tiny matrices, f32):
    #   stage A:  x @ MA + bA   replaces  ((x@A1+b1)@M1+c1)@M2+c2
    #   stage B:  y @ MB + cB   replaces  (y@M3+c3)@M4+c4
    M12 = M1 @ M2
    MA = A1 @ M12
    bA = b1 @ M12 + c1 @ M2 + c2
    MB = M3 @ M4
    cB = c3 @ M4 + c4

    # bf16 weights / HBM intermediates (memory-bound); biases & BN params stay f32.
    MA_b = MA.astype(jnp.bfloat16)
    MB_b = MB.astype(jnp.bfloat16)
    A1_b = A1.astype(jnp.bfloat16)

    cparams = pltpu.CompilerParams(
        dimension_semantics=("parallel",),          # independent P tiles (megacore OK)
        vmem_limit_bytes=_vmem_limit_bytes(),
    )

    def _const_spec(a):
        return pl.BlockSpec(a.shape, lambda i, _n=a.ndim: (0,) * _n)

    def _ce(flops, nbytes):
        return pl.CostEstimate(flops=int(flops), transcendentals=0,
                               bytes_accessed=int(nbytes))

    x_spec = pl.BlockSpec((bp, WCin), lambda i: (i, 0))
    act_spec = pl.BlockSpec((bp, WC), lambda i: (i, 0))
    stat_spec = pl.BlockSpec((1, 2, WC), lambda i: (i, 0, 0))
    act_shape = jax.ShapeDtypeStruct((P, WC), jnp.bfloat16)
    stat_shape = jax.ShapeDtypeStruct((T, 2, WC), jnp.float32)

    # stage A: conv_1x1 -> conv_1 -> conv_2 (single folded matmul) + BN1 partial stats
    z, st1 = pl.pallas_call(
        _stage_a_kernel,
        grid=(T,),
        in_specs=[x_spec, _const_spec(MA_b), _const_spec(bA)],
        out_specs=(act_spec, stat_spec),
        out_shape=(act_shape, stat_shape),
        compiler_params=cparams,
        cost_estimate=_ce(2 * P * WCin * WC + 6 * P * WC,
                          P * WCin * 4 + MA_b.size * 2 + P * WC * 2 + T * 2 * WC * 4),
    )(x2, MA_b, bA)

    s1, t1 = _finish_bn(st1, float(P * W), params['g1'], params['be1'], W, C)

    # stage B: bn_1 -> ReLU -> conv_3 -> conv_4 (single folded matmul) + BN2 partials
    w, st2 = pl.pallas_call(
        _stage_b_kernel,
        grid=(T,),
        in_specs=[act_spec, _const_spec(s1), _const_spec(t1),
                  _const_spec(MB_b), _const_spec(cB)],
        out_specs=(act_spec, stat_spec),
        out_shape=(act_shape, stat_shape),
        compiler_params=cparams,
        cost_estimate=_ce(2 * P * WC * WC + 9 * P * WC,
                          P * WC * 2 * 2 + MB_b.size * 2 + T * 2 * WC * 4),
    )(z, s1, t1, MB_b, cB)

    s2, t2 = _finish_bn(st2, float(P * W), params['g2'], params['be2'], W, C)

    # stage C: bn_2 + residual add (identity recomputed from x).  The dead stage-A z
    # buffer is donated as the output buffer (memory_space=pl.ANY -> no DMA for it).
    out2 = pl.pallas_call(
        _stage_c_kernel,
        grid=(T,),
        in_specs=[x_spec, _const_spec(A1_b), _const_spec(b1),
                  act_spec, _const_spec(s2), _const_spec(t2),
                  pl.BlockSpec(memory_space=pl.ANY)],
        out_specs=act_spec,
        out_shape=act_shape,
        compiler_params=cparams,
        input_output_aliases={6: 0},
        cost_estimate=_ce(2 * P * WCin * WC + 5 * P * WC,
                          P * WCin * 4 + A1_b.size * 2 + P * WC * 2 * 2),
    )(x2, A1_b, b1, w, s2, t2, z)

    # back to NCHW, f32 at the module boundary
    return jnp.transpose(out2.reshape(N, H, W, C), (0, 3, 1, 2)).astype(jnp.float32)


# ------------------------- pure-JAX reference (for correctness check) -----------------

def reference(x_nchw, params):
    N, Cin, H, W = x_nchw.shape
    x = jnp.transpose(x_nchw, (0, 2, 3, 1)).reshape(N * H, W, Cin)

    def conv1x5(t, w_taps, b):
        C = t.shape[-1]
        tp = jnp.pad(t, ((0, 0), (PAD, PAD), (0, 0)), mode='reflect')
        acc = jnp.zeros(t.shape, jnp.float32)
        for k in range(KRNL_W):
            acc = acc + jnp.einsum('pwc,cd->pwd', tp[:, k:k + W, :],
                                   w_taps[k * C:(k + 1) * C, :])
        return acc + b

    def bn(t, g, be):
        m = t.mean(axis=(0, 1), keepdims=True)
        v = ((t - m) ** 2).mean(axis=(0, 1), keepdims=True)
        return (t - m) / jnp.sqrt(v + EPS) * g + be

    y = jnp.einsum('pwc,cd->pwd', x, params['w1x1']) + params['b1x1']
    idn = y
    y = conv1x5(y, params['wc1'], params['bc1'])
    y = conv1x5(y, params['wc2'], params['bc2'])
    y = bn(y, params['g1'], params['be1'])
    y = jnp.maximum(y, 0.0)
    y = conv1x5(y, params['wc3'], params['bc3'])
    y = conv1x5(y, params['wc4'], params['bc4'])
    y = bn(y, params['g2'], params['be2'])
    out = y + idn
    Cout = out.shape[-1]
    return jnp.transpose(out.reshape(N, H, W, Cout), (0, 3, 1, 2))


# ------------------------- main --------------------------------------------------------

if __name__ == "__main__":
    key = jax.random.PRNGKey(0)
    N, Cin, Cout, H, W = 2, 4, 8, 16, 16          # in_chs=4, out_chs=8, krnl_size=(1,5)
    ks = jax.random.split(key, 12)

    def nrm(k, shape, scale=0.1):
        return scale * jax.random.normal(k, shape, dtype=jnp.float32)

    params = {
        # conv_1x1: PyTorch weight (Cout, Cin, 1, 1) stored here as (Cin, Cout)
        'w1x1': nrm(ks[0], (Cin, Cout)),
        'b1x1': nrm(ks[1], (1, 1, Cout)),
        # conv_k weights: PyTorch (Cout, Cout, 1, 5) stored as (5*Cout, Cout),
        # rows [k*Cout:(k+1)*Cout] = tap k as (Cin, Cout) (i.e. w[:, :, 0, k].T)
        'wc1': nrm(ks[2], (KRNL_W * Cout, Cout)), 'bc1': nrm(ks[3], (1, 1, Cout)),
        'wc2': nrm(ks[4], (KRNL_W * Cout, Cout)), 'bc2': nrm(ks[5], (1, 1, Cout)),
        'wc3': nrm(ks[6], (KRNL_W * Cout, Cout)), 'bc3': nrm(ks[7], (1, 1, Cout)),
        'wc4': nrm(ks[8], (KRNL_W * Cout, Cout)), 'bc4': nrm(ks[9], (1, 1, Cout)),
        # BatchNorm2d default affine params
        'g1': jnp.ones((1, 1, Cout), jnp.float32), 'be1': jnp.zeros((1, 1, Cout), jnp.float32),
        'g2': jnp.ones((1, 1, Cout), jnp.float32), 'be2': jnp.zeros((1, 1, Cout), jnp.float32),
    }

    x = jax.random.normal(ks[10], (N, Cin, H, W), dtype=jnp.float32)

    fn = jax.jit(subblock_type_a)                 # auto tile choice (P=32 -> bp=16, T=2)
    out = jax.block_until_ready(fn(x, params))
    ref = reference(x, params)

    assert out.shape == (N, Cout, H, W), out.shape
    # bf16 intermediates / weights -> looser tolerance than the f32-only 5e-4 build.
    err = float(jnp.max(jnp.abs(out - ref)))
    assert jnp.allclose(out, ref, atol=1e-1, rtol=1e-1), err
    print("KERNEL_OK")
</pallas_src>

<mosaic_0001>
module attributes {stable_mosaic.version = 11 : i64} {
  func.func @_stage_a_kernel(%arg0: i32, %arg1: memref<16x64xf32, #tpu.memory_space<vmem>>, %arg2: memref<64x128xbf16, #tpu.memory_space<vmem>>, %arg3: memref<1x128xf32, #tpu.memory_space<vmem>>, %arg4: memref<16x128xbf16, #tpu.memory_space<vmem>>, %arg5: memref<1x2x128xf32, #tpu.memory_space<vmem>>) attributes {dimension_semantics = [#tpu.dimension_semantics<parallel>], iteration_bounds = array<i64: 2>, scalar_prefetch = 0 : i64, scratch_operands = 0 : i64, tpu.core_type = #tpu.core_type<tc>, window_params = [{transform_indices = @transform_0, window_bounds = array<i64: 16, 64>}, {pipeline_mode = #tpu.pipeline_mode<synchronous>, transform_indices = @transform_1, window_bounds = array<i64: 64, 128>}, {pipeline_mode = #tpu.pipeline_mode<synchronous>, transform_indices = @transform_2, window_bounds = array<i64: 1, 128>}, {transform_indices = @transform_3, window_bounds = array<i64: 16, 128>}, {transform_indices = @transform_4, window_bounds = array<i64: 1, 2, 128>}]} {
    %c0 = arith.constant 0 : index
    %c0_0 = arith.constant 0 : index
    %0 = vector.load %arg1[%c0, %c0_0] : memref<16x64xf32, #tpu.memory_space<vmem>>, vector<16x64xf32>
    %1 = arith.truncf %0 : vector<16x64xf32> to vector<16x64xbf16>
    %c0_1 = arith.constant 0 : index
    %c0_2 = arith.constant 0 : index
    %2 = vector.load %arg2[%c0_1, %c0_2] : memref<64x128xbf16, #tpu.memory_space<vmem>>, vector<64x128xbf16>
    %cst = arith.constant dense<0.000000e+00> : vector<16x128xf32>
    %3 = tpu.matmul %1, %2, %cst {dimension_numbers = #tpu.dot_dimension_numbers<[1], [0], [0], [1], [0, 0, 1, 1], [], []>} : vector<16x64xbf16>, vector<64x128xbf16>, vector<16x128xf32> -> vector<16x128xf32>
    %c0_3 = arith.constant 0 : index
    %c0_4 = arith.constant 0 : index
    %4 = vector.load %arg3[%c0_3, %c0_4] : memref<1x128xf32, #tpu.memory_space<vmem>>, vector<1x128xf32>
    %5 = vector.broadcast %4 : vector<1x128xf32> to vector<16x128xf32>
    %6 = arith.addf %3, %5 : vector<16x128xf32>
    %cst_5 = arith.constant dense<0.000000e+00> : vector<128xf32>
    %7 = vector.multi_reduction <add>, %6, %cst_5 [0] : vector<16x128xf32> to vector<128xf32>
    %8 = vector.shape_cast %7 : vector<128xf32> to vector<1x128xf32>
    %c0_6 = arith.constant 0 : index
    %c0_7 = arith.constant 0 : index
    %c0_8 = arith.constant 0 : index
    %9 = vector.load %arg5[%c0_6, %c0_7, %c0_8] : memref<1x2x128xf32, #tpu.memory_space<vmem>>, vector<1x1x128xf32>
    %10 = vector.shape_cast %9 : vector<1x1x128xf32> to vector<1x128xf32>
    %11 = vector.shape_cast %8 : vector<1x128xf32> to vector<1x1x128xf32>
    tpu.vector_store %arg5[%c0_6, %c0_7, %c0_8], %11 {strides = array<i32>} : memref<1x2x128xf32, #tpu.memory_space<vmem>>, vector<1x1x128xf32>,
    %12 = arith.mulf %6, %6 : vector<16x128xf32>
    %cst_9 = arith.constant dense<0.000000e+00> : vector<128xf32>
    %13 = vector.multi_reduction <add>, %12, %cst_9 [0] : vector<16x128xf32> to vector<128xf32>
    %14 = vector.shape_cast %13 : vector<128xf32> to vector<1x128xf32>
    %c0_10 = arith.constant 0 : index
    %c1 = arith.constant 1 : index
    %c0_11 = arith.constant 0 : index
    %15 = vector.load %arg5[%c0_10, %c1, %c0_11] : memref<1x2x128xf32, #tpu.memory_space<vmem>>, vector<1x1x128xf32>
    %16 = vector.shape_cast %15 : vector<1x1x128xf32> to vector<1x128xf32>
    %17 = vector.shape_cast %14 : vector<1x128xf32> to vector<1x1x128xf32>
    tpu.vector_store %arg5[%c0_10, %c1, %c0_11], %17 {strides = array<i32>} : memref<1x2x128xf32, #tpu.memory_space<vmem>>, vector<1x1x128xf32>,
    %18 = arith.truncf %6 : vector<16x128xf32> to vector<16x128xbf16>
    %c0_12 = arith.constant 0 : index
    %c0_13 = arith.constant 0 : index
    %19 = vector.load %arg4[%c0_12, %c0_13] : memref<16x128xbf16, #tpu.memory_space<vmem>>, vector<16x128xbf16>
    tpu.vector_store %arg4[%c0_12, %c0_13], %18 {strides = array<i32>} : memref<16x128xbf16, #tpu.memory_space<vmem>>, vector<16x128xbf16>,
    return
  }
  func.func @transform_0(%arg0: i32) -> (i32, i32) {
    %c0_i32 = arith.constant 0 : i32
    %c0_i32_0 = arith.constant 0 : i32
    return %arg0, %c0_i32 : i32, i32
  }
  func.func @transform_1(%arg0: i32) -> (i32, i32) {
    %c0_i32 = arith.constant 0 : i32
    %c0_i32_0 = arith.constant 0 : i32
    %c0_i32_1 = arith.constant 0 : i32
    return %c0_i32, %c0_i32_0 : i32, i32
  }
  func.func @transform_2(%arg0: i32) -> (i32, i32) {
    %c0_i32 = arith.constant 0 : i32
    %c0_i32_0 = arith.constant 0 : i32
    %c0_i32_1 = arith.constant 0 : i32
    return %c0_i32, %c0_i32_0 : i32, i32
  }
  func.func @transform_3(%arg0: i32) -> (i32, i32) {
    %c0_i32 = arith.constant 0 : i32
    %c0_i32_0 = arith.constant 0 : i32
    return %arg0, %c0_i32 : i32, i32
  }
  func.func @transform_4(%arg0: i32) -> (i32, i32, i32) {
    %c0_i32 = arith.constant 0 : i32
    %c0_i32_0 = arith.constant 0 : i32
    %c0_i32_1 = arith.constant 0 : i32
    return %arg0, %c0_i32, %c0_i32_0 : i32, i32, i32
  }
}

module attributes {stable_mosaic.version = 11 : i64} {
  func.func @_stage_c_kernel(%arg0: i32, %arg1: memref<16x64xf32, #tpu.memory_space<vmem>>, %arg2: memref<64x128xbf16, #tpu.memory_space<vmem>>, %arg3: memref<1x128xf32, #tpu.memory_space<vmem>>, %arg4: memref<16x128xbf16, #tpu.memory_space<vmem>>, %arg5: memref<1x128xf32, #tpu.memory_space<vmem>>, %arg6: memref<1x128xf32, #tpu.memory_space<vmem>>, %arg7: memref<32x128xbf16, #tpu.memory_space<any>>, %arg8: memref<16x128xbf16, #tpu.memory_space<vmem>>) attributes {dimension_semantics = [#tpu.dimension_semantics<parallel>], iteration_bounds = array<i64: 2>, scalar_prefetch = 0 : i64, scratch_operands = 0 : i64, tpu.core_type = #tpu.core_type<tc>, window_params = [{transform_indices = @transform_0, window_bounds = array<i64: 16, 64>}, {pipeline_mode = #tpu.pipeline_mode<synchronous>, transform_indices = @transform_1, window_bounds = array<i64: 64, 128>}, {pipeline_mode = #tpu.pipeline_mode<synchronous>, transform_indices = @transform_2, window_bounds = array<i64: 1, 128>}, {transform_indices = @transform_3, window_bounds = array<i64: 16, 128>}, {pipeline_mode = #tpu.pipeline_mode<synchronous>, transform_indices = @transform_4, window_bounds = array<i64: 1, 128>}, {pipeline_mode = #tpu.pipeline_mode<synchronous>, transform_indices = @transform_5, window_bounds = array<i64: 1, 128>}, {}, {transform_indices = @transform_7, window_bounds = array<i64: 16, 128>}]} {
    %c0 = arith.constant 0 : index
    %c0_0 = arith.constant 0 : index
    %0 = vector.load %arg1[%c0, %c0_0] : memref<16x64xf32, #tpu.memory_space<vmem>>, vector<16x64xf32>
    %1 = arith.truncf %0 : vector<16x64xf32> to vector<16x64xbf16>
    %c0_1 = arith.constant 0 : index
    %c0_2 = arith.constant 0 : index
    %2 = vector.load %arg2[%c0_1, %c0_2] : memref<64x128xbf16, #tpu.memory_space<vmem>>, vector<64x128xbf16>
    %cst = arith.constant dense<0.000000e+00> : vector<16x128xf32>
    %3 = tpu.matmul %1, %2, %cst {dimension_numbers = #tpu.dot_dimension_numbers<[1], [0], [0], [1], [0, 0, 1, 1], [], []>} : vector<16x64xbf16>, vector<64x128xbf16>, vector<16x128xf32> -> vector<16x128xf32>
    %c0_3 = arith.constant 0 : index
    %c0_4 = arith.constant 0 : index
    %4 = vector.load %arg3[%c0_3, %c0_4] : memref<1x128xf32, #tpu.memory_space<vmem>>, vector<1x128xf32>
    %5 = vector.broadcast %4 : vector<1x128xf32> to vector<16x128xf32>
    %6 = arith.addf %3, %5 : vector<16x128xf32>
    %c0_5 = arith.constant 0 : index
    %c0_6 = arith.constant 0 : index
    %7 = vector.load %arg4[%c0_5, %c0_6] : memref<16x128xbf16, #tpu.memory_space<vmem>>, vector<16x128xbf16>
    %8 = arith.extf %7 : vector<16x128xbf16> to vector<16x128xf32>
    %c0_7 = arith.constant 0 : index
    %c0_8 = arith.constant 0 : index
    %9 = vector.load %arg5[%c0_7, %c0_8] : memref<1x128xf32, #tpu.memory_space<vmem>>, vector<1x128xf32>
    %10 = vector.broadcast %9 : vector<1x128xf32> to vector<16x128xf32>
    %11 = arith.mulf %8, %10 : vector<16x128xf32>
    %c0_9 = arith.constant 0 : index
    %c0_10 = arith.constant 0 : index
    %12 = vector.load %arg6[%c0_9, %c0_10] : memref<1x128xf32, #tpu.memory_space<vmem>>, vector<1x128xf32>
    %13 = vector.broadcast %12 : vector<1x128xf32> to vector<16x128xf32>
    %14 = arith.addf %11, %13 : vector<16x128xf32>
    %15 = arith.addf %14, %6 : vector<16x128xf32>
    %16 = arith.truncf %15 : vector<16x128xf32> to vector<16x128xbf16>
    %c0_11 = arith.constant 0 : index
    %c0_12 = arith.constant 0 : index
    %17 = vector.load %arg8[%c0_11, %c0_12] : memref<16x128xbf16, #tpu.memory_space<vmem>>, vector<16x128xbf16>
    tpu.vector_store %arg8[%c0_11, %c0_12], %16 {strides = array<i32>} : memref<16x128xbf16, #tpu.memory_space<vmem>>, vector<16x128xbf16>,
    return
  }
  func.func @transform_0(%arg0: i32) -> (i32, i32) {
    %c0_i32 = arith.constant 0 : i32
    %c0_i32_0 = arith.constant 0 : i32
    return %arg0, %c0_i32 : i32, i32
  }
  func.func @transform_1(%arg0: i32) -> (i32, i32) {
    %c0_i32 = arith.constant 0 : i32
    %c0_i32_0 = arith.constant 0 : i32
    %c0_i32_1 = arith.constant 0 : i32
    return %c0_i32, %c0_i32_0 : i32, i32
  }
  func.func @transform_2(%arg0: i32) -> (i32, i32) {
    %c0_i32 = arith.constant 0 : i32
    %c0_i32_0 = arith.constant 0 : i32
    %c0_i32_1 = arith.constant 0 : i32
    return %c0_i32, %c0_i32_0 : i32, i32
  }
  func.func @transform_3(%arg0: i32) -> (i32, i32) {
    %c0_i32 = arith.constant 0 : i32
    %c0_i32_0 = arith.constant 0 : i32
    return %arg0, %c0_i32 : i32, i32
  }
  func.func @transform_4(%arg0: i32) -> (i32, i32) {
    %c0_i32 = arith.constant 0 : i32
    %c0_i32_0 = arith.constant 0 : i32
    %c0_i32_1 = arith.constant 0 : i32
    return %c0_i32, %c0_i32_0 : i32, i32
  }
  func.func @transform_5(%arg0: i32) -> (i32, i32) {
    %c0_i32 = arith.constant 0 : i32
    %c0_i32_0 = arith.constant 0 : i32
    %c0_i32_1 = arith.constant 0 : i32
    return %c0_i32, %c0_i32_0 : i32, i32
  }
  func.func @transform_7(%arg0: i32) -> (i32, i32) {
    %c0_i32 = arith.constant 0 : i32
    %c0_i32_0 = arith.constant 0 : i32
    return %arg0, %c0_i32 : i32, i32
  }
}

module attributes {stable_mosaic.version = 11 : i64} {
  func.func @_stage_b_kernel(%arg0: i32, %arg1: memref<16x128xbf16, #tpu.memory_space<vmem>>, %arg2: memref<1x128xf32, #tpu.memory_space<vmem>>, %arg3: memref<1x128xf32, #tpu.memory_space<vmem>>, %arg4: memref<128x128xbf16, #tpu.memory_space<vmem>>, %arg5: memref<1x128xf32, #tpu.memory_space<vmem>>, %arg6: memref<16x128xbf16, #tpu.memory_space<vmem>>, %arg7: memref<1x2x128xf32, #tpu.memory_space<vmem>>) attributes {dimension_semantics = [#tpu.dimension_semantics<parallel>], iteration_bounds = array<i64: 2>, scalar_prefetch = 0 : i64, scratch_operands = 0 : i64, tpu.core_type = #tpu.core_type<tc>, window_params = [{transform_indices = @transform_0, window_bounds = array<i64: 16, 128>}, {pipeline_mode = #tpu.pipeline_mode<synchronous>, transform_indices = @transform_1, window_bounds = array<i64: 1, 128>}, {pipeline_mode = #tpu.pipeline_mode<synchronous>, transform_indices = @transform_2, window_bounds = array<i64: 1, 128>}, {pipeline_mode = #tpu.pipeline_mode<synchronous>, transform_indices = @transform_3, window_bounds = array<i64: 128, 128>}, {pipeline_mode = #tpu.pipeline_mode<synchronous>, transform_indices = @transform_4, window_bounds = array<i64: 1, 128>}, {transform_indices = @transform_5, window_bounds = array<i64: 16, 128>}, {transform_indices = @transform_6, window_bounds = array<i64: 1, 2, 128>}]} {
    %c0 = arith.constant 0 : index
    %c0_0 = arith.constant 0 : index
    %0 = vector.load %arg1[%c0, %c0_0] : memref<16x128xbf16, #tpu.memory_space<vmem>>, vector<16x128xbf16>
    %1 = arith.extf %0 : vector<16x128xbf16> to vector<16x128xf32>
    %c0_1 = arith.constant 0 : index
    %c0_2 = arith.constant 0 : index
    %2 = vector.load %arg2[%c0_1, %c0_2] : memref<1x128xf32, #tpu.memory_space<vmem>>, vector<1x128xf32>
    %3 = vector.broadcast %2 : vector<1x128xf32> to vector<16x128xf32>
    %4 = arith.mulf %1, %3 : vector<16x128xf32>
    %c0_3 = arith.constant 0 : index
    %c0_4 = arith.constant 0 : index
    %5 = vector.load %arg3[%c0_3, %c0_4] : memref<1x128xf32, #tpu.memory_space<vmem>>, vector<1x128xf32>
    %6 = vector.broadcast %5 : vector<1x128xf32> to vector<16x128xf32>
    %7 = arith.addf %4, %6 : vector<16x128xf32>
    %cst = arith.constant 0.000000e+00 : f32
    %8 = vector.broadcast %cst : f32 to vector<16x128xf32>
    %9 = arith.maximumf %7, %8 : vector<16x128xf32>
    %10 = arith.truncf %9 : vector<16x128xf32> to vector<16x128xbf16>
    %c0_5 = arith.constant 0 : index
    %c0_6 = arith.constant 0 : index
    %11 = vector.load %arg4[%c0_5, %c0_6] : memref<128x128xbf16, #tpu.memory_space<vmem>>, vector<128x128xbf16>
    %cst_7 = arith.constant dense<0.000000e+00> : vector<16x128xf32>
    %12 = tpu.matmul %10, %11, %cst_7 {dimension_numbers = #tpu.dot_dimension_numbers<[1], [0], [0], [1], [0, 0, 1, 1], [], []>} : vector<16x128xbf16>, vector<128x128xbf16>, vector<16x128xf32> -> vector<16x128xf32>
    %c0_8 = arith.constant 0 : index
    %c0_9 = arith.constant 0 : index
    %13 = vector.load %arg5[%c0_8, %c0_9] : memref<1x128xf32, #tpu.memory_space<vmem>>, vector<1x128xf32>
    %14 = vector.broadcast %13 : vector<1x128xf32> to vector<16x128xf32>
    %15 = arith.addf %12, %14 : vector<16x128xf32>
    %cst_10 = arith.constant dense<0.000000e+00> : vector<128xf32>
    %16 = vector.multi_reduction <add>, %15, %cst_10 [0] : vector<16x128xf32> to vector<128xf32>
    %17 = vector.shape_cast %16 : vector<128xf32> to vector<1x128xf32>
    %c0_11 = arith.constant 0 : index
    %c0_12 = arith.constant 0 : index
    %c0_13 = arith.constant 0 : index
    %18 = vector.load %arg7[%c0_11, %c0_12, %c0_13] : memref<1x2x128xf32, #tpu.memory_space<vmem>>, vector<1x1x128xf32>
    %19 = vector.shape_cast %18 : vector<1x1x128xf32> to vector<1x128xf32>
    %20 = vector.shape_cast %17 : vector<1x128xf32> to vector<1x1x128xf32>
    tpu.vector_store %arg7[%c0_11, %c0_12, %c0_13], %20 {strides = array<i32>} : memref<1x2x128xf32, #tpu.memory_space<vmem>>, vector<1x1x128xf32>,
    %21 = arith.mulf %15, %15 : vector<16x128xf32>
    %cst_14 = arith.constant dense<0.000000e+00> : vector<128xf32>
    %22 = vector.multi_reduction <add>, %21, %cst_14 [0] : vector<16x128xf32> to vector<128xf32>
    %23 = vector.shape_cast %22 : vector<128xf32> to vector<1x128xf32>
    %c0_15 = arith.constant 0 : index
    %c1 = arith.constant 1 : index
    %c0_16 = arith.constant 0 : index
    %24 = vector.load %arg7[%c0_15, %c1, %c0_16] : memref<1x2x128xf32, #tpu.memory_space<vmem>>, vector<1x1x128xf32>
    %25 = vector.shape_cast %24 : vector<1x1x128xf32> to vector<1x128xf32>
    %26 = vector.shape_cast %23 : vector<1x128xf32> to vector<1x1x128xf32>
    tpu.vector_store %arg7[%c0_15, %c1, %c0_16], %26 {strides = array<i32>} : memref<1x2x128xf32, #tpu.memory_space<vmem>>, vector<1x1x128xf32>,
    %27 = arith.truncf %15 : vector<16x128xf32> to vector<16x128xbf16>
    %c0_17 = arith.constant 0 : index
    %c0_18 = arith.constant 0 : index
    %28 = vector.load %arg6[%c0_17, %c0_18] : memref<16x128xbf16, #tpu.memory_space<vmem>>, vector<16x128xbf16>
    tpu.vector_store %arg6[%c0_17, %c0_18], %27 {strides = array<i32>} : memref<16x128xbf16, #tpu.memory_space<vmem>>, vector<16x128xbf16>,
    return
  }
  func.func @transform_0(%arg0: i32) -> (i32, i32) {
    %c0_i32 = arith.constant 0 : i32
    %c0_i32_0 = arith.constant 0 : i32
    return %arg0, %c0_i32 : i32, i32
  }
  func.func @transform_1(%arg0: i32) -> (i32, i32) {
    %c0_i32 = arith.constant 0 : i32
    %c0_i32_0 = arith.constant 0 : i32
    %c0_i32_1 = arith.constant 0 : i32
    return %c0_i32, %c0_i32_0 : i32, i32
  }
  func.func @transform_2(%arg0: i32) -> (i32, i32) {
    %c0_i32 = arith.constant 0 : i32
    %c0_i32_0 = arith.constant 0 : i32
    %c0_i32_1 = arith.constant 0 : i32
    return %c0_i32, %c0_i32_0 : i32, i32
  }
  func.func @transform_3(%arg0: i32) -> (i32, i32) {
    %c0_i32 = arith.constant 0 : i32
    %c0_i32_0 = arith.constant 0 : i32
    %c0_i32_1 = arith.constant 0 : i32
    return %c0_i32, %c0_i32_0 : i32, i32
  }
  func.func @transform_4(%arg0: i32) -> (i32, i32) {
    %c0_i32 = arith.constant 0 : i32
    %c0_i32_0 = arith.constant 0 : i32
    %c0_i32_1 = arith.constant 0 : i32
    return %c0_i32, %c0_i32_0 : i32, i32
  }
  func.func @transform_5(%arg0: i32) -> (i32, i32) {
    %c0_i32 = arith.constant 0 : i32
    %c0_i32_0 = arith.constant 0 : i32
    return %arg0, %c0_i32 : i32, i32
  }
  func.func @transform_6(%arg0: i32) -> (i32, i32, i32) {
    %c0_i32 = arith.constant 0 : i32
    %c0_i32_0 = arith.constant 0 : i32
    %c0_i32_1 = arith.constant 0 : i32
    return %arg0, %c0_i32, %c0_i32_0 : i32, i32, i32
  }
}

</mosaic_0001>

<bundles_post_ra>
// kernel: tile.42
= control target key start
LH: loop header
LB: loop body
LE: loop exit
PB: predicated region body
PF: predicated region fallthrough
CT: control target
= control target key end

     0   :  { %s28_s0 = inlined_call_operand.vmem [shape: f32[8], index: 0, kind: input, shape index: {}]   ;;  %s29_s1 = inlined_call_operand.vmem [shape: f32[16,8], index: 1, kind: output, shape index: {}]  }
   0x1   :  { %v4_v0 = vld [vmem:[%s28_s0] ss:$0 sm:$0xff] }
   0x2   :  { %5 = vst [vmem:[%s29_s1] sm:$0xff] %v4_v0  ;;  %8 = vst [vmem:[%s29_s1 + $0x8] sm:$0xff] %v4_v0 }

// kernel: tile.43
= control target key start
LH: loop header
LB: loop body
LE: loop exit
PB: predicated region body
PF: predicated region fallthrough
CT: control target
= control target key end

     0   :  { %s131_s10 = smov 120   ;;  %s132_s11 = smov 104   ;;  %vm3_vm0 = vcmask 64512   ;;  %vm9_vm1 = vcmask 1048512   ;;  %vm15_vm2 = vcmask 982912   ;;  %vm21_vm3 = vcmask 917312   ;;  %s207_s0 = inlined_call_operand.vmem [shape: f32[16,8], index: 0, kind: input, shape index: {}]   ;;  %s208_s1 = inlined_call_operand.vmem [shape: f32[1,128], index: 1, kind: output, shape index: {}]  }
   0x1   :  { %v101_v0 = vld [vmem:[%s207_s0 + $0xf] sm:$0x1]   ;;  %v103_v1 = vld [vmem:[%s207_s0 + $0xd] sm:$0x1]   ;;  %v102_v2 = vld [vmem:[%s207_s0 + $0xe] sm:$0x1]  }
   0x2   :  { %7 = vrot.lane.b32.xlu0 %v101_v0, %s131_s10  ;;  %19 = vrot.lane.b32.xlu1 %v103_v1, %s132_s11  ;;  %v104_v3 = vld [vmem:[%s207_s0 + $0xc] sm:$0x1]   ;;  %s133_s16 = smov 112   ;;  %s134_s17 = smov 96   ;;  %v105_v4 = vld [vmem:[%s207_s0 + $0xb] sm:$0x1]  }
   0x3   :  { %v106_v5 = vld [vmem:[%s207_s0 + $0xa] sm:$0x1]   ;;  %v2_v6 = vld [vmem:[%s207_s0] sm:$0x1]   ;;  %s135_s24 = smov 88   ;;  %s136_s25 = smov 80  }
   0x4   :  { %4 = vst.msk [vmem:[#allocation0] sm:$0x1] %vm3_vm0, %v2_v6   ;;  %v107_v7 = vld [vmem:[%s207_s0 + $0x9] sm:$0x1]   ;;  %v108_v8 = vld [vmem:[%s207_s0 + $0x8] sm:$0x1]  }
   0x5   :  { %s137_s30 = smov 72   ;;  %s138_s2 = smov 64   ;;  %v109_v9 = vld [vmem:[%s207_s0 + $0x7] sm:$0x1]   ;;  %v110_v10 = vld [vmem:[%s207_s0 + $0x6] sm:$0x1]  }
   0x6   :  { %13 = vrot.lane.b32.xlu0 %v102_v2, %s133_s16  ;;  %25 = vrot.lane.b32.xlu1 %v104_v3, %s134_s17  ;;  %s139_s7 = smov 56   ;;  %s140_s8 = smov 48   ;;  %v111_v11 = vld [vmem:[%s207_s0 + $0x5] sm:$0x1]   ;;  %v112_v12 = vld [vmem:[%s207_s0 + $0x4] sm:$0x1]  }
   0x7   :  { %s141_s13 = smov 40   ;;  %s142_s14 = smov 32   ;;  %v113_v13 = vld [vmem:[%s207_s0 + $0x3] sm:$0x1]   ;;  %v114_v14 = vld [vmem:[%s207_s0 + $0x2] sm:$0x1]  }
   0x8   :  { %s143_s19 = smov 24   ;;  %s144_s20 = smov 16   ;;  %v115_v15 = vld [vmem:[%s207_s0 + $0x1] sm:$0x1]   ;;  %vm27_vm4 = vcmask 851712   ;;  %vm33_vm5 = vcmask 786112  }
   0x9   :  { %s145_s0 = smov 8   ;;  %vm39_vm6 = vcmask 720512   ;;  %vm45_vm7 = vcmask 654912   ;;  %vm51_vm8 = vcmask 589312   ;;  %vm57_vm9 = vcmask 523712  }
   0xa   :  { %31 = vrot.lane.b32.xlu0 %v105_v4, %s135_s24  ;;  %37 = vrot.lane.b32.xlu1 %v106_v5, %s136_s25  ;;  %vm63_vm10 = vcmask 458112   ;;  %vm69_vm11 = vcmask 392512   ;;  %vm75_vm12 = vcmask 326912   ;;  %vm81_vm13 = vcmask 261312  }
   0xb   :  { %vm87_vm14 = vcmask 195712   ;;  %vm93_vm15 = vcmask 130112  }
   0xe   :  { %43 = vrot.lane.b32.xlu0 %v107_v7, %s137_s30  ;;  %49 = vrot.lane.b32.xlu1 %v108_v8, %s138_s2 }
  0x12   :  { %55 = vrot.lane.b32.xlu0 %v109_v9, %s139_s7  ;;  %61 = vrot.lane.b32.xlu1 %v110_v10, %s140_s8 }
  0x16   :  { %67 = vrot.lane.b32.xlu0 %v111_v11, %s141_s13  ;;  %73 = vrot.lane.b32.xlu1 %v112_v12, %s142_s14 }
  0x1a   :  { %79 = vrot.lane.b32.xlu0 %v113_v13, %s143_s19  ;;  %85 = vrot.lane.b32.xlu1 %v114_v14, %s144_s20 }
  0x1e   :  { %91 = vrot.lane.b32.xlu0 %v115_v15, %s145_s0 }
  0x74   :  { %v8_v16 = vpop.permute.xlu0 %7   ;;  %v20_v17 = vpop.permute.xlu1 %19  }
  0x75   :  { %10 = vst.msk [vmem:[#allocation0] sm:$0x1] %vm9_vm1, %v8_v16  }
  0x78   :  { %v14_v18 = vpop.permute.xlu0 %13   ;;  %v26_v19 = vpop.permute.xlu1 %25  }
  0x79   :  { %16 = vst.msk [vmem:[#allocation0] sm:$0x1] %vm15_vm2, %v14_v18  }
  0x7a   :  { %22 = vst.msk [vmem:[#allocation0] sm:$0x1] %vm21_vm3, %v20_v17  }
  0x7b   :  { %28 = vst.msk [vmem:[#allocation0] sm:$0x1] %vm27_vm4, %v26_v19  }
  0x7c   :  { %v32_v20 = vpop.permute.xlu0 %31   ;;  %v38_v21 = vpop.permute.xlu1 %37  }
  0x7d   :  { %34 = vst.msk [vmem:[#allocation0] sm:$0x1] %vm33_vm5, %v32_v20  }
  0x7e   :  { %40 = vst.msk [vmem:[#allocation0] sm:$0x1] %vm39_vm6, %v38_v21  }
  0x80   :  { %v44_v22 = vpop.permute.xlu0 %43   ;;  %v50_v23 = vpop.permute.xlu1 %49  }
  0x81   :  { %46 = vst.msk [vmem:[#allocation0] sm:$0x1] %vm45_vm7, %v44_v22  }
  0x82   :  { %52 = vst.msk [vmem:[#allocation0] sm:$0x1] %vm51_vm8, %v50_v23  }
  0x84   :  { %v56_v24 = vpop.permute.xlu0 %55   ;;  %v62_v25 = vpop.permute.xlu1 %61  }
  0x85   :  { %58 = vst.msk [vmem:[#allocation0] sm:$0x1] %vm57_vm9, %v56_v24  }
  0x86   :  { %64 = vst.msk [vmem:[#allocation0] sm:$0x1] %vm63_vm10, %v62_v25  }
  0x88   :  { %v68_v26 = vpop.permute.xlu0 %67   ;;  %v74_v27 = vpop.permute.xlu1 %73  }
  0x89   :  { %70 = vst.msk [vmem:[#allocation0] sm:$0x1] %vm69_vm11, %v68_v26  }
  0x8a   :  { %76 = vst.msk [vmem:[#allocation0] sm:$0x1] %vm75_vm12, %v74_v27  }
  0x8c   :  { %v80_v28 = vpop.permute.xlu0 %79   ;;  %v86_v29 = vpop.permute.xlu1 %85  }
  0x8d   :  { %82 = vst.msk [vmem:[#allocation0] sm:$0x1] %vm81_vm13, %v80_v28  }
  0x8e   :  { %88 = vst.msk [vmem:[#allocation0] sm:$0x1] %vm87_vm14, %v86_v29  }
  0x90   :  { %v92_v30 = vpop.permute.xlu0 %91  }
  0x91   :  { %94 = vst.msk [vmem:[#allocation0] sm:$0x1] %vm93_vm15, %v92_v30  }
  0x98   :  { %v98_v31 = vld [vmem:[#allocation0] sm:$0x1] }
  0x99   :  { %100 = vst [vmem:[%s208_s1] sm:$0x1] %v98_v31 }

// kernel: subblock_type_a.3
= control target key start
LH: loop header
LB: loop body
LE: loop exit
PB: predicated region body
PF: predicated region fallthrough
CT: control target
= control target key end

     0   :  { %s508_s15 = smov 0   ;;  %s548_s0 = inlined_call_operand.vmem [shape: f32[32,64], index: 0, kind: input, shape index: {}]   ;;  %s549_s1 = inlined_call_operand.vmem [shape: bf16[64,128], index: 1, kind: input, shape index: {}]   ;;  %s550_s2 = inlined_call_operand.vmem [shape: f32[1,128], index: 2, kind: input, shape index: {}]   ;;  %s551_s3 = inlined_call_operand.vmem [shape: bf16[32,128], index: 3, kind: output, shape index: {0}]   ;;  %s552_s4 = inlined_call_operand.vmem [shape: f32[2,2,128], index: 4, kind: output, shape index: {1}]  }
   0x1 LB: > { %s514_s16 = sadd.s32 4294967295, %s479_s15   ;;  %p419_p0 = scmp.ge.s32.totalorder %s479_s15, 1  ;;  %s479_s15 = sphi %s508_s15, %s15_s15  }
   0x2   : > { %p166_p1 = scmp.lt.s32.totalorder %s479_s15, 3 }
   0x4   : > { %p167_p2 = pnand %p419_p0, %p166_p1 }
   0x5   : > { %v469_v0 = vld [vmem:[%s549_s1] sm:$0xff] (!%p167_p2)   ;;  %v481_v1 = vmov (!%p167_p2), 0.0   ;;  %v470_v2 = vld [vmem:[%s549_s1 + $0x8] sm:$0xff] (!%p167_p2)   ;;  %vm482_vm0 = vmmov (!%p167_p2), 0   ;;  %s420_s21 = sshll.u32 (!%p167_p2), %s514_s16, 1  ;;  %v471_v3 = vld [vmem:[%s549_s1 + $0x10] sm:$0xff] (!%p167_p2)  }
   0x6   : > { %170 = sbr.rel (%p167_p2) target bundleno = 255 (0xff), region = 32  ;;  %447 = vmatprep.subr.bf16.mxu0 (!%p167_p2), %v481_v1  ;;  %455 = vmatprep.mubr.msk.bf16.mxu0 (!%p167_p2), %vm482_vm0, %v481_v1  ;;  %p197_p3 = scmp.lt.s32.totalorder (!%p167_p2), %s420_s21, 3  ;;  %v472_v4 = vld [vmem:[%s549_s1 + $0x18] sm:$0xff] (!%p167_p2)   ;;  %vm255_vm1 = vcmask (!%p167_p2), 523264   ;;  %v425_v8 = vld [vmem:[%s550_s2] ss:$0 sm:$0xff] (!%p167_p2) }
   0x7   : > { %448 = vmatpush3.bf16.msra.mxu0 (!%p167_p2), %v469_v0  ;;  %p208_p4 = scmp.lt.s32.totalorder (!%p167_p2), %s514_s16, 1 }
   0x8   : > { %449 = vmatprep.subr.bf16.mxu0 (!%p167_p2), %v481_v1 }
   0xb   : > { %450 = vmatpush3.bf16.msra.mxu0 (!%p167_p2), %v470_v2 }
   0xc   : > { %451 = vmatprep.subr.bf16.mxu0 (!%p167_p2), %v481_v1 }
   0xd   : > { %s554_s21 = smov (!%p197_p3, %s420_s21), 3  ;;  %s556_s16 = smov (!%p208_p4, %s514_s16), 1 }
   0xe   : > { %s421_s24 = sshll.u32 %s554_s21, 3  ;;  %s423_s6 = sshll.u32 %s554_s21, 2 }
   0xf   : > { %s200_s27 = scalar_lea.vmem %s548_s0, %s421_s24  ;;  %452 = vmatpush3.bf16.msra.mxu0 %v471_v3  ;;  %s206_s9 = scalar_lea.vmem %s551_s3, %s423_s6 }
  0x10   : > { %v213_v5 = vld [vmem:[%s200_s27] sm:$0xff]  ;;  %v214_v6 = vld [vmem:[%s200_s27 + $0x8] sm:$0xff]  ;;  %453 = vmatprep.subr.bf16.mxu0 %v481_v1  ;;  %s424_s10 = sshll.u32 %s556_s16, 1 }
  0x11   : > { %v215_v7 = vpack.c.bf16 %v214_v6, %v213_v5  ;;  %s211_s13 = scalar_lea.vmem %s552_s4, %s424_s10 }
  0x13   : > { %454 = vmatpush3.bf16.msra.mxu0 %v472_v4 }
  0x16   : > { %456 = vmatmul.mubr.msk.bf16.vlgmr.msra.gmra.mrb[0].mxu0 %vm255_vm1, %v215_v7 }
  0xe9   : > { %v293_v9 = vpop.f32.mrb[0].mxu0 }
  0xea   : > { %v294_v10 = vadd.f32 %v425_v8, %v293_v9  ;;  %v457_v11 = vpop.f32.mrb[1].mxu0 }
  0xeb   : > { %v296_v12 = vpop.f32.mrb[2].mxu0 }
  0xec   : > { %v297_v13 = vadd.f32 %v425_v8, %v296_v12  ;;  %v458_v14 = vpop.f32.mrb[3].mxu0  ;;  %v308_v15 = vmul.f32 %v294_v10, %v294_v10 }
  0xee   : > { %v300_v16 = vadd.f32 %v297_v13, %v294_v10  ;;  %v309_v17 = vmul.f32 %v297_v13, %v297_v13  ;;  %v440_v18 = vpack.c.bf16 %v297_v13, %v294_v10 }
  0xf0   : > { %v301_v19 = vrot.slane %v300_v16, 4  ;;  %v310_v20 = vadd.f32 %v309_v17, %v308_v15  ;;  %441 = vst [vmem:[%s206_s9] sm:$0xff] %v440_v18  }
  0xf2   : > { %v302_v21 = vadd.f32 %v301_v19, %v300_v16  ;;  %v311_v22 = vrot.slane %v310_v20, 4 }
  0xf4   : > { %v303_v23 = vrot.slane %v302_v21, 2  ;;  %v312_v24 = vadd.f32 %v311_v22, %v310_v20 }
  0xf6   : > { %v304_v25 = vadd.f32 %v303_v23, %v302_v21  ;;  %v313_v26 = vrot.slane %v312_v24, 2 }
  0xf8   : > { %v305_v27 = vrot.slane %v304_v25, 1  ;;  %v314_v28 = vadd.f32 %v313_v26, %v312_v24 }
  0xfa   : > { %v306_v29 = vadd.f32 %v305_v27, %v304_v25  ;;  %v315_v30 = vrot.slane %v314_v28, 1 }
  0xfc   : > { %307 = vst [vmem:[%s211_s13] sm:$0x1] %v306_v29  ;;  %v316_v31 = vadd.f32 %v315_v30, %v314_v28 }
  0xfe   : > { %317 = vst [vmem:[%s211_s13 + $0x1] sm:$0x1] %v316_v31 }
  0xff PF: > { %s15_s15 = sadd.s32 1, %s479_s15  }
 0x100   : > { %p12_p5 = scmp.ge.s32.totalorder %s15_s15, 4  }
 0x102   :  { %14 = sbr.rel (!%p12_p5) target bundleno = 1 (0x1), region = 74 }

// kernel: subblock_type_a.5
= control target key start
LH: loop header
LB: loop body
LE: loop exit
PB: predicated region body
PF: predicated region fallthrough
CT: control target
= control target key end

     0   :  { %s583_s24 = smov 0   ;;  %s628_s0 = inlined_call_operand.vmem [shape: f32[32,64], index: 0, kind: input, shape index: {}]   ;;  %s629_s1 = inlined_call_operand.vmem [shape: bf16[64,128], index: 1, kind: input, shape index: {}]   ;;  %s630_s2 = inlined_call_operand.vmem [shape: f32[1,128], index: 2, kind: input, shape index: {}]   ;;  %s631_s3 = inlined_call_operand.vmem [shape: bf16[32,128], index: 3, kind: input, shape index: {}]   ;;  %s632_s4 = inlined_call_operand.vmem [shape: f32[1,128], index: 4, kind: input, shape index: {}]   ;;  %s633_s5 = inlined_call_operand.vmem [shape: f32[1,128], index: 5, kind: input, shape index: {}]   ;;  %s634_s6 = inlined_call_operand.vmem [shape: bf16[32,128], index: 6, kind: input, shape index: {}, may-alias: {6,7}]   ;;  %s635_s7 = inlined_call_operand.vmem [shape: bf16[32,128], index: 7, kind: output, shape index: {}, may-alias: {6,7}]  }
   0x1 LB: > { %s468_s25 = sadd.s32 4294967295, %s539_s24   ;;  %p472_p0 = scmp.ge.s32.totalorder %s539_s24, 1  ;;  %s539_s24 = sphi %s583_s24, %s17_s24  }
   0x2   : > { %p225_p1 = scmp.lt.s32.totalorder %s539_s24, 3 }
   0x4   : > { %p226_p2 = pnand %p472_p0, %p225_p1 }
   0x5   : > { %v529_v0 = vld [vmem:[%s629_s1] sm:$0xff] (!%p226_p2)   ;;  %v541_v1 = vmov (!%p226_p2), 0.0   ;;  %v530_v2 = vld [vmem:[%s629_s1 + $0x8] sm:$0xff] (!%p226_p2)   ;;  %vm542_vm0 = vmmov (!%p226_p2), 0   ;;  %s473_s29 = sshll.u32 (!%p226_p2), %s468_s25, 1  ;;  %v531_v3 = vld [vmem:[%s629_s1 + $0x10] sm:$0xff] (!%p226_p2)  }
   0x6   : > { %229 = sbr.rel (%p226_p2) target bundleno = 243 (0xf3), region = 44  ;;  %507 = vmatprep.subr.bf16.mxu0 (!%p226_p2), %v541_v1  ;;  %515 = vmatprep.mubr.msk.bf16.mxu0 (!%p226_p2), %vm542_vm0, %v541_v1  ;;  %p261_p3 = scmp.lt.s32.totalorder (!%p226_p2), %s473_s29, 3  ;;  %v532_v4 = vld [vmem:[%s629_s1 + $0x18] sm:$0xff] (!%p226_p2)   ;;  %vm321_vm1 = vcmask (!%p226_p2), 523264   ;;  %v485_v10 = vld [vmem:[%s632_s4] ss:$0 sm:$0xff] (!%p226_p2) }
   0x7   : > { %508 = vmatpush3.bf16.msra.mxu0 (!%p226_p2), %v529_v0  ;;  %v486_v13 = vld [vmem:[%s633_s5] ss:$0 sm:$0xff] (!%p226_p2) }
   0x8   : > { %509 = vmatprep.subr.bf16.mxu0 (!%p226_p2), %v541_v1  ;;  %v479_v15 = vld [vmem:[%s630_s2] ss:$0 sm:$0xff] (!%p226_p2) }
   0xb   : > { %510 = vmatpush3.bf16.msra.mxu0 (!%p226_p2), %v530_v2 }
   0xc   : > { %511 = vmatprep.subr.bf16.mxu0 (!%p226_p2), %v541_v1 }
   0xd   : > { %s637_s29 = smov (!%p261_p3, %s473_s29), 3 }
   0xe   : > { %s474_s9 = sshll.u32 %s637_s29, 3  ;;  %s476_s15 = sshll.u32 %s637_s29, 2 }
   0xf   : > { %s264_s12 = scalar_lea.vmem %s628_s0, %s474_s9  ;;  %512 = vmatpush3.bf16.msra.mxu0 %v531_v3  ;;  %s270_s18 = scalar_lea.vmem %s631_s3, %s476_s15 }
  0x10   : > { %v279_v5 = vld [vmem:[%s264_s12] sm:$0xff]  ;;  %v280_v6 = vld [vmem:[%s264_s12 + $0x8] sm:$0xff]  ;;  %513 = vmatprep.subr.bf16.mxu0 %v541_v1  ;;  %s276_s27 = scalar_lea.vmem %s635_s7, %s476_s15 }
  0x11   : > { %v281_v7 = vpack.c.bf16 %v280_v6, %v279_v5  ;;  %v494_v8 = vld [vmem:[%s270_s18] sm:$0xff]  }
  0x12   : > { %v495_v9 = vunpack.c.l.bf16 %v494_v8  ;;  %v496_v11 = vunpack.c.h.bf16 %v494_v8 }
  0x13   : > { %514 = vmatpush3.bf16.msra.mxu0 %v532_v4 }
  0x14   : > { %v377_v12 = vmul.f32 %v495_v9, %v485_v10  ;;  %v378_v14 = vmul.f32 %v496_v11, %v485_v10 }
  0x16   : > { %516 = vmatmul.mubr.msk.bf16.vlgmr.msra.gmra.mrb[0].mxu0 %vm321_vm1, %v281_v7  ;;  %v386_v16 = vadd.f32 %v486_v13, %v377_v12  ;;  %v387_v20 = vadd.f32 %v486_v13, %v378_v14 }
  0xe9   : > { %v359_v17 = vpop.f32.mrb[0].mxu0 }
  0xea   : > { %v360_v18 = vadd.f32 %v479_v15, %v359_v17  ;;  %v517_v19 = vpop.f32.mrb[1].mxu0 }
  0xeb   : > { %v362_v21 = vpop.f32.mrb[2].mxu0 }
  0xec   : > { %v388_v22 = vadd.f32 %v386_v16, %v360_v18  ;;  %v363_v23 = vadd.f32 %v479_v15, %v362_v21  ;;  %v518_v24 = vpop.f32.mrb[3].mxu0 }
  0xee   : > { %v389_v25 = vadd.f32 %v387_v20, %v363_v23 }
  0xf0   : > { %v500_v26 = vpack.c.bf16 %v389_v25, %v388_v22 }
  0xf2   : > { %501 = vst [vmem:[%s276_s27] sm:$0xff] %v500_v26  }
  0xf3 PF: > { %s17_s24 = sadd.s32 1, %s539_s24  }
  0xf4   : > { %p14_p4 = scmp.ge.s32.totalorder %s17_s24, 4  }
  0xf6   :  { %16 = sbr.rel (!%p14_p4) target bundleno = 1 (0x1), region = 77 }

// kernel: subblock_type_a.4
= control target key start
LH: loop header
LB: loop body
LE: loop exit
PB: predicated region body
PF: predicated region fallthrough
CT: control target
= control target key end

     0   :  { %s647_s21 = smov 0   ;;  %s712_s0 = inlined_call_operand.vmem [shape: bf16[32,128], index: 0, kind: input, shape index: {}]   ;;  %s713_s1 = inlined_call_operand.vmem [shape: f32[1,128], index: 1, kind: input, shape index: {}]   ;;  %s714_s2 = inlined_call_operand.vmem [shape: f32[1,128], index: 2, kind: input, shape index: {}]   ;;  %s715_s3 = inlined_call_operand.vmem [shape: bf16[128,128], index: 3, kind: input, shape index: {}]   ;;  %s716_s4 = inlined_call_operand.vmem [shape: f32[1,128], index: 4, kind: input, shape index: {}]   ;;  %s717_s5 = inlined_call_operand.vmem [shape: bf16[32,128], index: 5, kind: output, shape index: {0}]   ;;  %s718_s6 = inlined_call_operand.vmem [shape: f32[2,2,128], index: 6, kind: output, shape index: {1}]  }
   0x1 LB: > { %s653_s22 = sadd.s32 4294967295, %s608_s21   ;;  %p523_p0 = scmp.ge.s32.totalorder %s608_s21, 1  ;;  %s608_s21 = sphi %s647_s21, %s17_s21  }
   0x2   : > { %p216_p1 = scmp.lt.s32.totalorder %s608_s21, 3 }
   0x4   : > { %p217_p2 = pnand %p523_p0, %p216_p1 }
   0x5   : > { %v594_v0 = vld [vmem:[%s715_s3] sm:$0xff] (!%p217_p2)   ;;  %v610_v1 = vmov (!%p217_p2), 0.0   ;;  %v595_v2 = vld [vmem:[%s715_s3 + $0x8] sm:$0xff] (!%p217_p2)   ;;  %vm611_vm0 = vmmov (!%p217_p2), 0   ;;  %s524_s27 = sshll.u32 (!%p217_p2), %s653_s22, 1  ;;  %v596_v3 = vld [vmem:[%s715_s3 + $0x10] sm:$0xff] (!%p217_p2)  }
   0x6   : > { %220 = sbr.rel (%p217_p2) target bundleno = 271 (0x10f), region = 40  ;;  %564 = vmatprep.subr.bf16.mxu0 (!%p217_p2), %v610_v1  ;;  %580 = vmatprep.mubr.msk.bf16.mxu0 (!%p217_p2), %vm611_vm0, %v610_v1  ;;  %p251_p3 = scmp.lt.s32.totalorder (!%p217_p2), %s524_s27, 3  ;;  %v597_v4 = vld [vmem:[%s715_s3 + $0x18] sm:$0xff] (!%p217_p2)   ;;  %v598_v8 = vld [vmem:[%s715_s3 + $0x20] sm:$0xff] (!%p217_p2)   ;;  %v599_v12 = vld [vmem:[%s715_s3 + $0x28] sm:$0xff] (!%p217_p2)  }
   0x7   : > { %565 = vmatpush3.bf16.msra.mxu0 (!%p217_p2), %v594_v0  ;;  %v529_v9 = vld [vmem:[%s713_s1] ss:$0 sm:$0xff] (!%p217_p2)  ;;  %v600_v16 = vld [vmem:[%s715_s3 + $0x30] sm:$0xff] (!%p217_p2)   ;;  %v601_v19 = vld [vmem:[%s715_s3 + $0x38] sm:$0xff] (!%p217_p2)   ;;  %p262_p4 = scmp.lt.s32.totalorder (!%p217_p2), %s653_s22, 1 }
   0x8   : > { %566 = vmatprep.subr.bf16.mxu0 (!%p217_p2), %v610_v1  ;;  %v530_v13 = vld [vmem:[%s714_s2] ss:$0 sm:$0xff] (!%p217_p2) }
   0x9   : > { %v531_v21 = vld [vmem:[%s716_s4] ss:$0 sm:$0xff] (!%p217_p2) }
   0xb   : > { %567 = vmatpush3.bf16.msra.mxu0 (!%p217_p2), %v595_v2 }
   0xc   : > { %568 = vmatprep.subr.bf16.mxu0 (!%p217_p2), %v610_v1 }
   0xd   : > { %s720_s27 = smov (!%p251_p3, %s524_s27), 3  ;;  %s722_s22 = smov (!%p262_p4, %s653_s22), 1 }
   0xe   : > { %s525_s30 = sshll.u32 %s720_s27, 2 }
   0xf   : > { %s254_s9 = scalar_lea.vmem %s712_s0, %s525_s30  ;;  %569 = vmatpush3.bf16.msra.mxu0 %v596_v3  ;;  %s260_s8 = scalar_lea.vmem %s717_s5, %s525_s30 }
  0x10   : > { %v547_v5 = vld [vmem:[%s254_s9] sm:$0xff]   ;;  %570 = vmatprep.subr.bf16.mxu0 %v610_v1  ;;  %s528_s9 = sshll.u32 %s722_s22, 1 }
  0x11   : > { %v548_v6 = vunpack.c.l.bf16 %v547_v5  ;;  %v549_v7 = vunpack.c.h.bf16 %v547_v5  ;;  %s265_s10 = scalar_lea.vmem %s718_s6, %s528_s9 }
  0x13   : > { %571 = vmatpush3.bf16.msra.mxu0 %v597_v4  ;;  %v278_v10 = vmul.f32 %v548_v6, %v529_v9  ;;  %v279_v11 = vmul.f32 %v549_v7, %v529_v9 }
  0x14   : > { %572 = vmatprep.subr.bf16.mxu0 %v610_v1 }
  0x15   : > { %v287_v14 = vadd.f32 %v530_v13, %v278_v10  ;;  %v288_v15 = vadd.f32 %v530_v13, %v279_v11 }
  0x17   : > { %573 = vmatpush3.bf16.msra.mxu0 %v598_v8  ;;  %v289_v17 = vmax.f32 %v287_v14, 0.0  ;;  %v290_v18 = vmax.f32 %v288_v15, 0.0 }
  0x18   : > { %574 = vmatprep.subr.bf16.mxu0 %v610_v1 }
  0x19   : > { %v291_v20 = vpack.c.bf16 %v290_v18, %v289_v17 }
  0x1b   : > { %575 = vmatpush3.bf16.msra.mxu0 %v599_v12 }
  0x1c   : > { %576 = vmatprep.subr.bf16.mxu0 %v610_v1 }
  0x1f   : > { %577 = vmatpush3.bf16.msra.mxu0 %v600_v16 }
  0x20   : > { %578 = vmatprep.subr.bf16.mxu0 %v610_v1 }
  0x23   : > { %579 = vmatpush3.bf16.msra.mxu0 %v601_v19 }
  0x26   : > { %581 = vmatmul.mubr.bf16.vlgmr.msra.gmra.mrb[0].mxu0 %v291_v20 }
  0xf9   : > { %v397_v22 = vpop.f32.mrb[0].mxu0 }
  0xfa   : > { %v398_v23 = vadd.f32 %v531_v21, %v397_v22  ;;  %v582_v24 = vpop.f32.mrb[1].mxu0 }
  0xfb   : > { %v400_v25 = vpop.f32.mrb[2].mxu0 }
  0xfc   : > { %v401_v26 = vadd.f32 %v531_v21, %v400_v25  ;;  %v583_v27 = vpop.f32.mrb[3].mxu0  ;;  %v412_v28 = vmul.f32 %v398_v23, %v398_v23 }
  0xfe   : > { %v404_v29 = vadd.f32 %v401_v26, %v398_v23  ;;  %v413_v30 = vmul.f32 %v401_v26, %v401_v26  ;;  %v553_v31 = vpack.c.bf16 %v401_v26, %v398_v23 }
 0x100   : > { %v405_v32 = vrot.slane %v404_v29, 4  ;;  %v414_v33 = vadd.f32 %v413_v30, %v412_v28  ;;  %554 = vst [vmem:[%s260_s8] sm:$0xff] %v553_v31  }
 0x102   : > { %v406_v34 = vadd.f32 %v405_v32, %v404_v29  ;;  %v415_v35 = vrot.slane %v414_v33, 4 }
 0x104   : > { %v407_v36 = vrot.slane %v406_v34, 2  ;;  %v416_v37 = vadd.f32 %v415_v35, %v414_v33 }
 0x106   : > { %v408_v38 = vadd.f32 %v407_v36, %v406_v34  ;;  %v417_v39 = vrot.slane %v416_v37, 2 }
 0x108   : > { %v409_v40 = vrot.slane %v408_v38, 1  ;;  %v418_v41 = vadd.f32 %v417_v39, %v416_v37 }
 0x10a   : > { %v410_v42 = vadd.f32 %v409_v40, %v408_v38  ;;  %v419_v43 = vrot.slane %v418_v41, 1 }
 0x10c   : > { %411 = vst [vmem:[%s265_s10] sm:$0x1] %v410_v42  ;;  %v420_v44 = vadd.f32 %v419_v43, %v418_v41 }
 0x10e   : > { %421 = vst [vmem:[%s265_s10 + $0x1] sm:$0x1] %v420_v44 }
 0x10f PF: > { %s17_s21 = sadd.s32 1, %s608_s21  }
 0x110   : > { %p14_p5 = scmp.ge.s32.totalorder %s17_s21, 4  }
 0x112   :  { %16 = sbr.rel (!%p14_p5) target bundleno = 1 (0x1), region = 82 }

</bundles_post_ra>
